<compile_context>
chip_gen: v6e
topology: v6e:2x2x1
jax: 0.10.0
libtpu: 0.0.40
codegen_flags: <defaults>
</compile_context>

<pallas_src>
import functools

import jax
import jax.numpy as jnp
import numpy as np
from jax.experimental import pallas as pl
from jax.experimental.pallas import tpu as pltpu


def _alpha_composite_kernel(frag_ref, alpha_ref, gath_ref, bg_ref, out_ref, *, apply_bg):
    # frag_ref : (1, K, T)    int32   nearest-point indices (z-sorted), -1 == no point
    # alpha_ref: (1, K, T)    float32 per-point alpha weights
    # gath_ref : (1, K, C, T) float32 per-pixel gathered point features
    # bg_ref   : (C, 1)       float32 background color (ignored if apply_bg=False)
    # out_ref  : (1, C, T)    float32 composited features for this (batch, HW-tile) block
    K = frag_ref.shape[1]
    C = out_ref.shape[1]
    T = out_ref.shape[2]

    idx = frag_ref[0, :, :]                                  # (K, T) int32
    a_eff = jnp.where(idx >= 0, alpha_ref[0, :, :], 0.0)     # invalid points contribute nothing
    one_minus = 1.0 - a_eff                                  # (K, T)

    acc = jnp.zeros((C, T), jnp.float32)
    cum = jnp.ones((1, T), jnp.float32)                      # running prod_{l<k} (1 - alpha_l)
    for k in range(K):                                       # K is small; static unroll
        w_k = a_eff[k:k + 1, :] * cum                        # (1, T)
        acc = acc + w_k * gath_ref[0, k, :, :]               # (C, T) fused mul-add
        cum = cum * one_minus[k:k + 1, :]

    if apply_bg:
        # Pixels whose nearest point index (k == 0) is negative get the background color.
        bg_mask = idx[0:1, :] < 0                            # (1, T)
        acc = jnp.where(bg_mask, bg_ref[...], acc)           # (1,T) x (C,1) -> (C,T)

    out_ref[0, :, :] = acc


def _choose_tile(hw, k, c, budget_bytes=16 * 1024 * 1024, t_cap=8192):
    """Largest multiple-of-128 lane tile whose double-buffered blocks fit the VMEM budget."""
    per_lane = 4 * (2 * k + k * c + c)                       # frag + alpha + gathered + out (f32/int32)
    t = budget_bytes // (2 * max(per_lane, 1))               # 2x for double buffering
    t = max(128, min(t_cap, (t // 128) * 128))
    hw128 = -(-hw // 128) * 128
    return min(t, hw128)


def alpha_compositor_forward(fragments, alphas, ptclds, background_color=None):
    """JAX/Pallas equivalent of AlphaCompositor().forward(fragments, alphas, ptclds)."""
    N, K, H, W = fragments.shape
    C, P = ptclds.shape
    HW = H * W

    frag = fragments.reshape(N, K, HW).astype(jnp.int32)
    alph = alphas.reshape(N, K, HW).astype(jnp.float32)
    feat = ptclds.astype(jnp.float32)

    # Pre-gather per-pixel features with XLA (keeps HW as the minor dim -> cheap relayout);
    # the kernel then only does an O(K*C*HW), HBM-bound weighted reduction.
    safe_idx = jnp.clip(frag, 0, P - 1)
    gathered = jnp.transpose(feat[:, safe_idx], (1, 2, 0, 3))        # (N, K, C, HW)

    T = _choose_tile(HW, K, C)
    HW_pad = -(-HW // T) * T
    if HW_pad != HW:
        pad = HW_pad - HW
        frag = jnp.pad(frag, ((0, 0), (0, 0), (0, pad)), constant_values=-1)
        alph = jnp.pad(alph, ((0, 0), (0, 0), (0, pad)))
        gathered = jnp.pad(gathered, ((0, 0), (0, 0), (0, 0), (0, pad)))

    apply_bg = background_color is not None
    if apply_bg:
        bg = jnp.asarray(background_color, dtype=jnp.float32)
        if bg.ndim != 1:
            raise ValueError("Wrong shape of background_color")
        if bg.shape[0] == 3 and C == 4:
            bg = jnp.concatenate([bg, jnp.ones((1,), bg.dtype)])
        if bg.shape[0] != C:
            raise ValueError(f"background color has {bg.shape[0]} channels not {C}")
    else:
        bg = jnp.zeros((C,), jnp.float32)
    bg_col = bg.reshape(C, 1)

    kernel = functools.partial(_alpha_composite_kernel, apply_bg=apply_bg)

    # VMEM limit derived from the actual double-buffered block footprints (+ slack),
    # capped at 48 MiB so the same choice is safe on v7x's 64 MiB physical VMEM.
    block_bytes = T * 4 * (2 * K + K * C + C) + C * 4
    vmem_limit = int(min(max(2 * block_bytes + (4 << 20), 16 << 20), 48 << 20))

    out_flat = pl.pallas_call(
        kernel,
        out_shape=jax.ShapeDtypeStruct((N, C, HW_pad), jnp.float32),
        grid_spec=pltpu.PrefetchScalarGridSpec(
            num_scalar_prefetch=0,
            grid=(N, HW_pad // T),
            in_specs=[
                pl.BlockSpec((1, K, T), lambda n, j: (n, 0, j)),
                pl.BlockSpec((1, K, T), lambda n, j: (n, 0, j)),
                pl.BlockSpec((1, K, C, T), lambda n, j: (n, 0, 0, j)),
                pl.BlockSpec((C, 1), lambda n, j: (0, 0)),
            ],
            out_specs=pl.BlockSpec((1, C, T), lambda n, j: (n, 0, j)),
        ),
        compiler_params=pltpu.CompilerParams(
            dimension_semantics=("parallel", "parallel"),
            vmem_limit_bytes=vmem_limit,
        ),
    )(frag, alph, gathered, bg_col)

    return out_flat[:, :, :HW].reshape(N, C, H, W)


def _reference_forward(fragments, alphas, ptclds, background_color=None):
    """Pure-JAX reference mirroring pytorch3d alpha_composite + background masking."""
    N, K, H, W = fragments.shape
    C, P = ptclds.shape
    valid = fragments >= 0
    a_eff = jnp.where(valid, alphas, 0.0)
    cum = jnp.cumprod(1.0 - a_eff, axis=1)
    cum = jnp.concatenate([jnp.ones_like(cum[:, :1]), cum[:, :-1]], axis=1)
    w = cum * a_eff                                                  # (N,K,H,W)
    gathered = ptclds[:, jnp.clip(fragments, 0, P - 1)]              # (C,N,K,H,W)
    out = jnp.einsum("nkhw,cnkhw->nchw", w, gathered)
    if background_color is not None:
        bg = jnp.asarray(background_color, dtype=out.dtype)
        if bg.shape[0] == 3 and C == 4:
            bg = jnp.concatenate([bg, jnp.ones((1,), bg.dtype)])
        mask = (fragments[:, 0] < 0)[:, None]                        # (N,1,H,W)
        out = jnp.where(mask, bg[None, :, None, None], out)
    return out


if __name__ == "__main__":
    key = jax.random.PRNGKey(0)
    N, K, H, W = 2, 8, 16, 16   # batch, points_per_pixel, image_size, image_size
    C, P = 4, 32                # rgba features, number of points in the packed cloud

    k1, k2, k3 = jax.random.split(key, 3)
    # -1 entries mark pixels with no corresponding point.
    fragments = jax.random.randint(k1, (N, K, H, W), -1, P, dtype=jnp.int32)
    alphas = jax.random.uniform(k2, (N, K, H, W), dtype=jnp.float32)
    ptclds = jax.random.normal(k3, (C, P), dtype=jnp.float32)
    background_color = (0.1, 0.2, 0.3)   # rgb; alpha=1 appended like the PyTorch module

    out = alpha_compositor_forward(fragments, alphas, ptclds, background_color)
    out = jax.block_until_ready(out)

    ref = _reference_forward(fragments, alphas, ptclds, background_color)
    assert out.shape == (N, C, H, W)
    np.testing.assert_allclose(np.asarray(out), np.asarray(ref), rtol=1e-5, atol=1e-5)

    # Also exercise the background_color=None path.
    out_nobg = jax.block_until_ready(
        alpha_compositor_forward(fragments, alphas, ptclds, None))
    ref_nobg = _reference_forward(fragments, alphas, ptclds, None)
    np.testing.assert_allclose(np.asarray(out_nobg), np.asarray(ref_nobg),
                               rtol=1e-5, atol=1e-5)

    print("KERNEL_OK")
</pallas_src>

<mosaic_0001>
module attributes {stable_mosaic.version = 11 : i64} {
  func.func @_alpha_composite_kernel(%arg0: i32, %arg1: i32, %arg2: memref<1x8x256xi32, #tpu.memory_space<vmem>>, %arg3: memref<1x8x256xf32, #tpu.memory_space<vmem>>, %arg4: memref<1x8x4x256xf32, #tpu.memory_space<vmem>>, %arg5: memref<4x1xf32, #tpu.memory_space<vmem>>, %arg6: memref<1x4x256xf32, #tpu.memory_space<vmem>>) attributes {dimension_semantics = [#tpu.dimension_semantics<parallel>, #tpu.dimension_semantics<parallel>], iteration_bounds = array<i64: 2, 1>, scalar_prefetch = 0 : i64, scratch_operands = 0 : i64, tpu.core_type = #tpu.core_type<tc>, window_params = [{transform_indices = @transform_0, window_bounds = array<i64: 1, 8, 256>}, {transform_indices = @transform_1, window_bounds = array<i64: 1, 8, 256>}, {transform_indices = @transform_2, window_bounds = array<i64: 1, 8, 4, 256>}, {pipeline_mode = #tpu.pipeline_mode<synchronous>, transform_indices = @transform_3, window_bounds = array<i64: 4, 1>}, {transform_indices = @transform_4, window_bounds = array<i64: 1, 4, 256>}]} {
    %c0 = arith.constant 0 : index
    %c0_0 = arith.constant 0 : index
    %c0_1 = arith.constant 0 : index
    %0 = vector.load %arg2[%c0, %c0_0, %c0_1] : memref<1x8x256xi32, #tpu.memory_space<vmem>>, vector<1x8x256xi32>
    %1 = vector.shape_cast %0 : vector<1x8x256xi32> to vector<8x256xi32>
    %c0_i32 = arith.constant 0 : i32
    %2 = vector.broadcast %c0_i32 : i32 to vector<8x256xi32>
    %3 = arith.cmpi sge, %1, %2 : vector<8x256xi32>
    %c0_2 = arith.constant 0 : index
    %c0_3 = arith.constant 0 : index
    %c0_4 = arith.constant 0 : index
    %4 = vector.load %arg3[%c0_2, %c0_3, %c0_4] : memref<1x8x256xf32, #tpu.memory_space<vmem>>, vector<1x8x256xf32>
    %5 = vector.shape_cast %4 : vector<1x8x256xf32> to vector<8x256xf32>
    %cst = arith.constant 0.000000e+00 : f32
    %6 = vector.broadcast %cst : f32 to vector<8x256xf32>
    %7 = arith.select %3, %5, %6 : vector<8x256xi1>, vector<8x256xf32>
    %cst_5 = arith.constant 1.000000e+00 : f32
    %8 = vector.broadcast %cst_5 : f32 to vector<8x256xf32>
    %9 = arith.subf %8, %7 : vector<8x256xf32>
    %cst_6 = arith.constant 0.000000e+00 : f32
    %10 = vector.broadcast %cst_6 : f32 to vector<4x256xf32>
    %cst_7 = arith.constant 1.000000e+00 : f32
    %11 = vector.broadcast %cst_7 : f32 to vector<1x256xf32>
    %12 = vector.extract_strided_slice %7 {offsets = [0, 0], sizes = [1, 256], strides = [1, 1]} : vector<8x256xf32> to vector<1x256xf32>
    %13 = arith.mulf %12, %11 : vector<1x256xf32>
    %c0_8 = arith.constant 0 : index
    %c0_9 = arith.constant 0 : index
    %c0_10 = arith.constant 0 : index
    %c0_11 = arith.constant 0 : index
    %14 = vector.load %arg4[%c0_8, %c0_9, %c0_10, %c0_11] : memref<1x8x4x256xf32, #tpu.memory_space<vmem>>, vector<1x1x4x256xf32>
    %15 = vector.shape_cast %14 : vector<1x1x4x256xf32> to vector<4x256xf32>
    %16 = vector.broadcast %13 : vector<1x256xf32> to vector<4x256xf32>
    %17 = arith.mulf %16, %15 : vector<4x256xf32>
    %18 = arith.addf %10, %17 : vector<4x256xf32>
    %19 = vector.extract_strided_slice %9 {offsets = [0, 0], sizes = [1, 256], strides = [1, 1]} : vector<8x256xf32> to vector<1x256xf32>
    %20 = arith.mulf %11, %19 : vector<1x256xf32>
    %21 = vector.extract_strided_slice %7 {offsets = [1, 0], sizes = [1, 256], strides = [1, 1]} : vector<8x256xf32> to vector<1x256xf32>
    %22 = arith.mulf %21, %20 : vector<1x256xf32>
    %c0_12 = arith.constant 0 : index
    %c1 = arith.constant 1 : index
    %c0_13 = arith.constant 0 : index
    %c0_14 = arith.constant 0 : index
    %23 = vector.load %arg4[%c0_12, %c1, %c0_13, %c0_14] : memref<1x8x4x256xf32, #tpu.memory_space<vmem>>, vector<1x1x4x256xf32>
    %24 = vector.shape_cast %23 : vector<1x1x4x256xf32> to vector<4x256xf32>
    %25 = vector.broadcast %22 : vector<1x256xf32> to vector<4x256xf32>
    %26 = arith.mulf %25, %24 : vector<4x256xf32>
    %27 = arith.addf %18, %26 : vector<4x256xf32>
    %28 = vector.extract_strided_slice %9 {offsets = [1, 0], sizes = [1, 256], strides = [1, 1]} : vector<8x256xf32> to vector<1x256xf32>
    %29 = arith.mulf %20, %28 : vector<1x256xf32>
    %30 = vector.extract_strided_slice %7 {offsets = [2, 0], sizes = [1, 256], strides = [1, 1]} : vector<8x256xf32> to vector<1x256xf32>
    %31 = arith.mulf %30, %29 : vector<1x256xf32>
    %c0_15 = arith.constant 0 : index
    %c2 = arith.constant 2 : index
    %c0_16 = arith.constant 0 : index
    %c0_17 = arith.constant 0 : index
    %32 = vector.load %arg4[%c0_15, %c2, %c0_16, %c0_17] : memref<1x8x4x256xf32, #tpu.memory_space<vmem>>, vector<1x1x4x256xf32>
    %33 = vector.shape_cast %32 : vector<1x1x4x256xf32> to vector<4x256xf32>
    %34 = vector.broadcast %31 : vector<1x256xf32> to vector<4x256xf32>
    %35 = arith.mulf %34, %33 : vector<4x256xf32>
    %36 = arith.addf %27, %35 : vector<4x256xf32>
    %37 = vector.extract_strided_slice %9 {offsets = [2, 0], sizes = [1, 256], strides = [1, 1]} : vector<8x256xf32> to vector<1x256xf32>
    %38 = arith.mulf %29, %37 : vector<1x256xf32>
    %39 = vector.extract_strided_slice %7 {offsets = [3, 0], sizes = [1, 256], strides = [1, 1]} : vector<8x256xf32> to vector<1x256xf32>
    %40 = arith.mulf %39, %38 : vector<1x256xf32>
    %c0_18 = arith.constant 0 : index
    %c3 = arith.constant 3 : index
    %c0_19 = arith.constant 0 : index
    %c0_20 = arith.constant 0 : index
    %41 = vector.load %arg4[%c0_18, %c3, %c0_19, %c0_20] : memref<1x8x4x256xf32, #tpu.memory_space<vmem>>, vector<1x1x4x256xf32>
    %42 = vector.shape_cast %41 : vector<1x1x4x256xf32> to vector<4x256xf32>
    %43 = vector.broadcast %40 : vector<1x256xf32> to vector<4x256xf32>
    %44 = arith.mulf %43, %42 : vector<4x256xf32>
    %45 = arith.addf %36, %44 : vector<4x256xf32>
    %46 = vector.extract_strided_slice %9 {offsets = [3, 0], sizes = [1, 256], strides = [1, 1]} : vector<8x256xf32> to vector<1x256xf32>
    %47 = arith.mulf %38, %46 : vector<1x256xf32>
    %48 = vector.extract_strided_slice %7 {offsets = [4, 0], sizes = [1, 256], strides = [1, 1]} : vector<8x256xf32> to vector<1x256xf32>
    %49 = arith.mulf %48, %47 : vector<1x256xf32>
    %c0_21 = arith.constant 0 : index
    %c4 = arith.constant 4 : index
    %c0_22 = arith.constant 0 : index
    %c0_23 = arith.constant 0 : index
    %50 = vector.load %arg4[%c0_21, %c4, %c0_22, %c0_23] : memref<1x8x4x256xf32, #tpu.memory_space<vmem>>, vector<1x1x4x256xf32>
    %51 = vector.shape_cast %50 : vector<1x1x4x256xf32> to vector<4x256xf32>
    %52 = vector.broadcast %49 : vector<1x256xf32> to vector<4x256xf32>
    %53 = arith.mulf %52, %51 : vector<4x256xf32>
    %54 = arith.addf %45, %53 : vector<4x256xf32>
    %55 = vector.extract_strided_slice %9 {offsets = [4, 0], sizes = [1, 256], strides = [1, 1]} : vector<8x256xf32> to vector<1x256xf32>
    %56 = arith.mulf %47, %55 : vector<1x256xf32>
    %57 = vector.extract_strided_slice %7 {offsets = [5, 0], sizes = [1, 256], strides = [1, 1]} : vector<8x256xf32> to vector<1x256xf32>
    %58 = arith.mulf %57, %56 : vector<1x256xf32>
    %c0_24 = arith.constant 0 : index
    %c5 = arith.constant 5 : index
    %c0_25 = arith.constant 0 : index
    %c0_26 = arith.constant 0 : index
    %59 = vector.load %arg4[%c0_24, %c5, %c0_25, %c0_26] : memref<1x8x4x256xf32, #tpu.memory_space<vmem>>, vector<1x1x4x256xf32>
    %60 = vector.shape_cast %59 : vector<1x1x4x256xf32> to vector<4x256xf32>
    %61 = vector.broadcast %58 : vector<1x256xf32> to vector<4x256xf32>
    %62 = arith.mulf %61, %60 : vector<4x256xf32>
    %63 = arith.addf %54, %62 : vector<4x256xf32>
    %64 = vector.extract_strided_slice %9 {offsets = [5, 0], sizes = [1, 256], strides = [1, 1]} : vector<8x256xf32> to vector<1x256xf32>
    %65 = arith.mulf %56, %64 : vector<1x256xf32>
    %66 = vector.extract_strided_slice %7 {offsets = [6, 0], sizes = [1, 256], strides = [1, 1]} : vector<8x256xf32> to vector<1x256xf32>
    %67 = arith.mulf %66, %65 : vector<1x256xf32>
    %c0_27 = arith.constant 0 : index
    %c6 = arith.constant 6 : index
    %c0_28 = arith.constant 0 : index
    %c0_29 = arith.constant 0 : index
    %68 = vector.load %arg4[%c0_27, %c6, %c0_28, %c0_29] : memref<1x8x4x256xf32, #tpu.memory_space<vmem>>, vector<1x1x4x256xf32>
    %69 = vector.shape_cast %68 : vector<1x1x4x256xf32> to vector<4x256xf32>
    %70 = vector.broadcast %67 : vector<1x256xf32> to vector<4x256xf32>
    %71 = arith.mulf %70, %69 : vector<4x256xf32>
    %72 = arith.addf %63, %71 : vector<4x256xf32>
    %73 = vector.extract_strided_slice %9 {offsets = [6, 0], sizes = [1, 256], strides = [1, 1]} : vector<8x256xf32> to vector<1x256xf32>
    %74 = arith.mulf %65, %73 : vector<1x256xf32>
    %75 = vector.extract_strided_slice %7 {offsets = [7, 0], sizes = [1, 256], strides = [1, 1]} : vector<8x256xf32> to vector<1x256xf32>
    %76 = arith.mulf %75, %74 : vector<1x256xf32>
    %c0_30 = arith.constant 0 : index
    %c7 = arith.constant 7 : index
    %c0_31 = arith.constant 0 : index
    %c0_32 = arith.constant 0 : index
    %77 = vector.load %arg4[%c0_30, %c7, %c0_31, %c0_32] : memref<1x8x4x256xf32, #tpu.memory_space<vmem>>, vector<1x1x4x256xf32>
    %78 = vector.shape_cast %77 : vector<1x1x4x256xf32> to vector<4x256xf32>
    %79 = vector.broadcast %76 : vector<1x256xf32> to vector<4x256xf32>
    %80 = arith.mulf %79, %78 : vector<4x256xf32>
    %81 = arith.addf %72, %80 : vector<4x256xf32>
    %82 = vector.extract_strided_slice %1 {offsets = [0, 0], sizes = [1, 256], strides = [1, 1]} : vector<8x256xi32> to vector<1x256xi32>
    %c0_i32_33 = arith.constant 0 : i32
    %83 = vector.broadcast %c0_i32_33 : i32 to vector<1x256xi32>
    %84 = arith.cmpi slt, %82, %83 : vector<1x256xi32>
    %c0_34 = arith.constant 0 : index
    %c0_35 = arith.constant 0 : index
    %85 = vector.load %arg5[%c0_34, %c0_35] : memref<4x1xf32, #tpu.memory_space<vmem>>, vector<4x1xf32>
    %86 = vector.shape_cast %84 : vector<1x256xi1> to vector<1x256xi1>
    %87 = vector.broadcast %86 : vector<1x256xi1> to vector<4x256xi1>
    %88 = vector.shape_cast %85 : vector<4x1xf32> to vector<4x1xf32>
    %89 = vector.broadcast %88 : vector<4x1xf32> to vector<4x256xf32>
    %90 = arith.select %87, %89, %81 : vector<4x256xi1>, vector<4x256xf32>
    %c0_36 = arith.constant 0 : index
    %c0_37 = arith.constant 0 : index
    %c0_38 = arith.constant 0 : index
    %91 = vector.load %arg6[%c0_36, %c0_37, %c0_38] : memref<1x4x256xf32, #tpu.memory_space<vmem>>, vector<1x4x256xf32>
    %92 = vector.shape_cast %91 : vector<1x4x256xf32> to vector<4x256xf32>
    %93 = vector.shape_cast %90 : vector<4x256xf32> to vector<1x4x256xf32>
    tpu.vector_store %arg6[%c0_36, %c0_37, %c0_38], %93 {strides = array<i32>} : memref<1x4x256xf32, #tpu.memory_space<vmem>>, vector<1x4x256xf32>,
    return
  }
  func.func @transform_0(%arg0: i32, %arg1: i32) -> (i32, i32, i32) {
    %c0_i32 = arith.constant 0 : i32
    %c0_i32_0 = arith.constant 0 : i32
    return %arg0, %c0_i32, %arg1 : i32, i32, i32
  }
  func.func @transform_1(%arg0: i32, %arg1: i32) -> (i32, i32, i32) {
    %c0_i32 = arith.constant 0 : i32
    %c0_i32_0 = arith.constant 0 : i32
    return %arg0, %c0_i32, %arg1 : i32, i32, i32
  }
  func.func @transform_2(%arg0: i32, %arg1: i32) -> (i32, i32, i32, i32) {
    %c0_i32 = arith.constant 0 : i32
    %c0_i32_0 = arith.constant 0 : i32
    %c0_i32_1 = arith.constant 0 : i32
    return %arg0, %c0_i32, %c0_i32_0, %arg1 : i32, i32, i32, i32
  }
  func.func @transform_3(%arg0: i32, %arg1: i32) -> (i32, i32) {
    %c0_i32 = arith.constant 0 : i32
    %c0_i32_0 = arith.constant 0 : i32
    %c0_i32_1 = arith.constant 0 : i32
    return %c0_i32, %c0_i32_0 : i32, i32
  }
  func.func @transform_4(%arg0: i32, %arg1: i32) -> (i32, i32, i32) {
    %c0_i32 = arith.constant 0 : i32
    %c0_i32_0 = arith.constant 0 : i32
    return %arg0, %c0_i32, %arg1 : i32, i32, i32
  }
}

</mosaic_0001>

<bundles_post_ra>
// kernel: tpu_custom_call.1
= control target key start
LH: loop header
LB: loop body
LE: loop exit
PB: predicated region body
PF: predicated region fallthrough
CT: control target
= control target key end

     0   :  { %s1329_s0 = inlined_call_operand.hbm [shape: s32[2,8,256], index: 0, kind: input, shape index: {}]   ;;  %s1330_s1 = inlined_call_operand.hbm [shape: f32[2,8,256], index: 1, kind: input, shape index: {}]   ;;  %s1331_s2 = inlined_call_operand.hbm [shape: f32[2,8,4,256], index: 2, kind: input, shape index: {}]   ;;  %s1332_s3 = inlined_call_operand.vmem [shape: f32[4,1], index: 3, kind: input, shape index: {}]   ;;  %s1333_s4 = inlined_call_operand.hbm [shape: f32[2,4,256], index: 4, kind: output, shape index: {}]  }
   0x1   :  { %1338 = sst [smem:[#allocation16_spill]] %s1330_s1 }
   0x2   :  { %9 = vsyncpa [#allocation3], 0 }
   0x3   :  { %11 = vsyncpa [#allocation3 + $0x1], 0 }
   0x4   :  { %12 = vsyncpa [#allocation6], 0 }
   0x5   :  { %14 = vsyncpa [#allocation6 + $0x1], 0 }
   0x6   :  { %15 = vsyncpa [#allocation4], 0 }
   0x7   :  { %17 = vsyncpa [#allocation4 + $0x1], 0  ;;  %s1053_s15 = smov 0   ;;  %s1055_s16 = smov 0  }
   0x8   :  { %s1057_s17 = smov 0   ;;  %s1059_s18 = smov 0  }
   0x9   :  { %s1061_s19 = smov 0   ;;  %s1063_s20 = smov 0  }
   0xa LB: > { %1339 = sst [smem:[#allocation12_spill]] %s1007_s17  ;;  %s1084_s21 = sadd.s32 4294967295, %s1019_s20   ;;  %s1019_s20 = sphi %s1063_s20, %s23_s20   ;;  %s1015_s19 = sphi %s1061_s19, %s1358_s19   ;;  %s1011_s18 = sphi %s1059_s18, %s1357_s18   ;;  %s1007_s17 = sphi %s1057_s17, %s1353_s17   ;;  %s1003_s16 = sphi %s1055_s16, %s1356_s16   ;;  %s999_s15 = sphi %s1053_s15, %s1355_s15  }
   0xb   : > { %1340 = sst [smem:[#allocation13_spill]] %s1019_s20  ;;  %s734_s22 = sadd.s32 4294967294, %s1019_s20  }
   0xc   : > { %s35_s23 = sadd.s32 1, %s1015_s19  ;;  %s44_s24 = sadd.s32 1, %s1007_s17 }
   0xd   : > { %p37_p0 = scmp.ge.s32.totalorder %s35_s23, 2  ;;  %p51_p1 = scmp.ne.s32.totalorder %s1007_s17, %s1003_s16 }
   0xe   : > { %p52_p2 = scmp.eq.s32.totalorder %s1019_s20, 0  ;;  %p57_p3 = scmp.ne.s32.totalorder %s1003_s16, %s999_s15 }
   0xf   : > { %s1360_s23 = smov (%p37_p0, %s35_s23), 0  ;;  %p58_p5 = scmp.eq.s32.totalorder %s1084_s21, 0 }
  0x10   : > { %1341 = sst [smem:[#allocation14_spill]] %s1360_s23  ;;  %p1096_p4 = por %p52_p2, %p51_p1 }
  0x11   : > { %s39_s26 = ssub.s32 %s1015_s19, %s1360_s23  ;;  %p160_p6 = scmp.eq.s32.totalorder %s1084_s21, 1 }
  0x12   : > { %p42_p7 = scmp.eq.s32.totalorder %s39_s26, 0  ;;  %p1104_p8 = por %p58_p5, %p57_p3 }
  0x13   : > { %p1108_p9 = por %p160_p6, %p51_p1  ;;  %p166_p10 = scmp.eq.s32.totalorder %s734_s22, 1 }
  0x14   : > { %s1113_s29 = scalar_select %p42_p7, %s1007_s17, %s44_s24  }
  0x15   : > { %p1115_p11 = por %p166_p10, %p57_p3  ;;  %p789_p13 = scmp.lt.s32.totalorder %s1019_s20, 2 }
  0x16   : > { %1345 = sst [smem:[#allocation15_spill]] %s1113_s29  ;;  %s1122_s5 = sand.u32 1, %s1007_s17  }
  0x17   : > { %s737_s6 = sshll.u32 %s1122_s5, 4  ;;  %s763_s7 = sshll.u32 %s1015_s19, 8 }
  0x18   : > { %p1128_p0 = pnand %p789_p13, %p1096_p4  ;;  %s210_s9 = sand.u32 1, %s1019_s20  }
  0x19   : > { %s1348_s1 = sld [smem:[#allocation16_spill]]  ;;  %s214_s13 = scalar_lea.vmem [#allocation5], %s737_s6 }
  0x1a   : > { %s224_s14 = sshll.u32 %s214_s13, 4  ;;  %s743_s22 = sshll.u32 %s1122_s5, 6  ;;  %s225_s14 = int_to_ptr.vmem [resolvable:$true] %s224_s14 }
  0x1b   : > { %s1141_s24 = scalar_lea.sflag [#allocation6], %s210_s9  ;;  %p853_p1 = pneg %p1128_p0 }
  0x1c   : > { %s864_s25 = scalar_lea.vmem %s225_s14, 256  ;;  %s1021_s26 = smov [#allocation5]  }
  0x1d   : > { %p865_p2 = scmp.ne.s32.totalorder %s225_s14, %s864_s25  ;;  %s869_s23 = sshll.u32 %s1021_s26, 4  ;;  %s870_s23 = int_to_ptr.vmem [resolvable:$false] %s869_s23 }
  0x1e   : > { %s871_s10 = scalar_lea.vmem %s870_s23, 512  ;;  %p872_p5 = scmp.lt.s32.totalorder %s225_s14, %s870_s23 }
  0x1f   : > { %s222_s12 = scalar_lea.hbm %s1348_s1, %s763_s7  ;;  %p867_p3 = pnand %p865_p2, %p853_p1 }
  0x20   : > { %p873_p6 = scmp.lt.s32.totalorder %s871_s10, %s864_s25 }
  0x21   : > { %p868_p4 = pneg %p867_p3 }
  0x22   : > { %p874_p7 = por %p873_p6, %p872_p5 }
  0x24   : > { %p875_p10 = pnand %p874_p7, %p868_p4 }
  0x26   : > { %878 = shalt.err (!%p875_p10)
}
  0x27   : > { %781 = dma.hbm_to_vmem [thread:$0]  (!%p1128_p0), %s222_s12, 256, %s225_s14, %s1141_s24  }
  0x28   : > { %s235_s9 = scalar_lea.vmem [#allocation7], %s743_s22  ;;  %p746_p13 = scmp.ge.s32.totalorder %s1019_s20, 1 }
  0x29   : > { %s244_s11 = sshll.u32 %s235_s9, 4  ;;  %p252_p2 = scmp.lt.s32.totalorder %s1019_s20, 3  ;;  %s1152_s11 = int_to_ptr.vmem [resolvable:$true] %s244_s11 }
  0x2a   : > { %s201_s26 = scalar_lea.hbm %s1329_s0, %s763_s7  ;;  %s193_s10 = scalar_lea.vmem [#allocation2], %s737_s6 }
  0x2b   : > { %p1155_p3 = pnand %p746_p13, %p252_p2  ;;  %s203_s1 = sshll.u32 %s193_s10, 4  ;;  %s204_s1 = int_to_ptr.vmem [resolvable:$true] %s203_s1 }
  0x2c   : > { %s765_s12 = sshll.u32 %s1015_s19, 10  ;;  %s190_s29 = scalar_lea.sflag [#allocation3], %s1122_s5 }
  0x2d   : > { %s1170_s9 = scalar_lea.hbm %s1331_s2, %s765_s12  ;;  %s892_s17 = scalar_lea.vmem %s204_s1, 256 }
  0x2e   : > { %p893_p4 = scmp.ne.s32.totalorder %s204_s1, %s892_s17  ;;  %s1022_s20 = smov [#allocation2]  }
  0x2f   : > { %s897_s13 = sshll.u32 %s1022_s20, 4  ;;  %s898_s13 = int_to_ptr.vmem [resolvable:$false] %s897_s13 }
  0x30   : > { %p895_p5 = pnand %p893_p4, %p853_p1  ;;  %s899_s7 = scalar_lea.vmem %s898_s13, 512 }
  0x31   : > { %p900_p7 = scmp.lt.s32.totalorder %s204_s1, %s898_s13  ;;  %p901_p10 = scmp.lt.s32.totalorder %s899_s7, %s892_s17 }
  0x32   : > { %p896_p6 = pneg %p895_p5 }
  0x33   : > { %p902_p13 = por %p901_p10, %p900_p7 }
  0x35   : > { %p903_p2 = pnand %p902_p13, %p896_p6 }
  0x37   : > { %906 = shalt.err (!%p903_p2)
}
  0x38   : > { %778 = dma.hbm_to_vmem [thread:$0]  (!%p1128_p0), %s201_s26, 256, %s204_s1, %s190_s29  }
  0x39   : > { %s920_s5 = scalar_lea.vmem %s1152_s11, 1024  ;;  %s1023_s20 = smov [#allocation7]  }
  0x3a   : > { %p921_p12 = scmp.ne.s32.totalorder %s1152_s11, %s920_s5  ;;  %s925_s6 = sshll.u32 %s1023_s20, 4  ;;  %s926_s6 = int_to_ptr.vmem [resolvable:$false] %s925_s6 }
  0x3b   : > { %s927_s17 = scalar_lea.vmem %s926_s6, 2048  ;;  %p928_p7 = scmp.lt.s32.totalorder %s1152_s11, %s926_s6 }
  0x3c   : > { %p923_p4 = pnand %p921_p12, %p853_p1  ;;  %p929_p6 = scmp.lt.s32.totalorder %s927_s17, %s920_s5 }
  0x3e   : > { %p924_p5 = pneg %p923_p4  ;;  %p930_p10 = por %p929_p6, %p928_p7 }
  0x40   : > { %p931_p13 = pnand %p930_p10, %p924_p5 }
  0x42   : > { %934 = shalt.err (!%p931_p13)
}
  0x43   : > { %s1024_s25 = smov 128   ;;  %s1025_s1 = smov 8  }
  0x44   : > { %784 = dma.hbm_to_vmem [thread:$0]  (!%p1128_p0), %s1170_s9, 1024, %s1152_s11, %s1141_s24, %s1024_s25, %s1024_s25, %s1025_s1  }
  0x45   : > { %256 = sbr.rel (%p1155_p3) target bundleno = 220 (0xdc), region = 36  ;;  %s1192_s29 = sand.u32 (!%p1155_p3), 1, %s1003_s16  }
  0x46   : > { %s747_s26 = sshll.u32 (!%p1155_p3), %s1192_s29, 4  ;;  %s259_s10 = scalar_lea.sflag (!%p1155_p3), [#allocation3], %s1192_s29 }
  0x47   : > { %s262_s12 = scalar_lea.vmem (!%p1155_p3), [#allocation2], %s747_s26 }
  0x4a   : > { %986 = dma.done.wait (%p1104_p8), %s259_s10, 256  }
  0x4b   : > { %988 = vsyncadd (%p1104_p8), %s259_s10, 4294967040  ;;  %s267_s8 = sand.u32 1, %s1084_s21   ;;  %s271_s11 = scalar_lea.vmem [#allocation5], %s747_s26 }
  0x4c   : > { %s268_s24 = scalar_lea.sflag [#allocation6], %s267_s8 }
  0x4d   : > { %990 = dma.done.wait (%p1104_p8), %s268_s24, 1280  }
  0x4e   : > { %992 = vsyncadd (%p1104_p8), %s268_s24, 4294966016  ;;  %v1026_v0 = vmov 0   ;;  %v558_v1 = vld [vmem:[%s1332_s3] sm:$0xf]  ;;  %v1211_v3 = vld [vmem:[%s262_s12 + $0x8] sm:$0xff]  ;;  %v330_v10 = vlaneseq  ;;  %s749_s21 = sshll.u32 %s1192_s29, 6 }
  0x4f   : > { %842 = vset.pattern.permute.xlu0 %v1026_v0  ;;  %v1209_v2 = vld [vmem:[%s262_s12] sm:$0xff]  ;;  %vm322_vm1 = vcmp.ge.s32.totalorder %v1211_v3, 0  ;;  %v324_v5 = vld [vmem:[%s271_s11 + $0x8] sm:$0xff]  ;;  %s1242_s27 = scalar_lea.vmem [#allocation7], %s749_s21  ;;  %vm557_vm3 = vcmp.lt.s32.totalorder %v1211_v3, 0  ;;  %s750_s22 = sshll.u32 %s1192_s29, 3 }
  0x50   : > { %573 = vperm.xlu0 %842, %v558_v1   ;;  %vm321_vm0 = vcmp.ge.s32.totalorder %v1209_v2, 0  ;;  %v323_v4 = vld [vmem:[%s271_s11] sm:$0xff]  ;;  %v1217_v7 = vsel %vm322_vm1, %v324_v5, 0.0  ;;  %v1228_v13 = vshrl.u32 %v330_v10, 7  ;;  %v751_v25 = vld [vmem:[%s1242_s27 + $0x8] sm:$0xff]  ;;  %v753_v58 = vld [vmem:[%s1242_s27 + $0x18] sm:$0xff] }
  0x51   : > { %v1215_v6 = vsel %vm321_vm0, %v323_v4, 0.0  ;;  %v1223_v9 = vsub.f32 1.0, %v1217_v7  ;;  %v329_v24 = vld [vmem:[%s1242_s27] sm:$0xff]  ;;  %v364_v38 = vcombine.high %v751_v25, %v751_v25  ;;  %v752_v39 = vld [vmem:[%s1242_s27 + $0x10] sm:$0xff]  ;;  %vm556_vm2 = vcmp.lt.s32.totalorder %v1209_v2, 0  ;;  %s766_s9 = sshll.u32 %s1011_s18, 7 }
  0x52   : > { %v1220_v8 = vsub.f32 1.0, %v1215_v6  ;;  %v1237_v20 = vsub.s32 0, %v1228_v13  ;;  %v357_v21 = vsub.s32 1, %v1228_v13  ;;  %v388_v32 = vsub.s32 2, %v1228_v13  ;;  %s314_s13 = scalar_lea.vmem [#allocation8], %s750_s22  ;;  %s598_s6 = scalar_lea.hbm %s1333_s4, %s766_s9 }
  0x53   : > { %v371_v12 = vrot.slane %v1223_v9, 1  ;;  %v348_v15 = vrot.slane %v1223_v9, 7  ;;  %v402_v19 = vrot.slane %v1223_v9, 2  ;;  %v433_v31 = vrot.slane %v1223_v9, 3  ;;  %s600_s7 = sshll.u32 %s314_s13, 4  ;;  %s584_s17 = scalar_lea.sflag [#allocation4], %s1192_s29  ;;  %s601_s7 = int_to_ptr.vmem [resolvable:$true] %s600_s7 }
  0x54   : > { %v370_v11 = vrot.slane %v1220_v8, 1  ;;  %v347_v14 = vrot.slane %v1220_v8, 7  ;;  %v401_v18 = vrot.slane %v1220_v8, 2  ;;  %v432_v30 = vrot.slane %v1220_v8, 3  ;;  %s935_s25 = scalar_lea.vmem %s601_s7, 128  ;;  %s1027_s1 = smov [#allocation8]  }
  0x55   : > { %v375_v17 = vmul.f32 %v371_v12, %v1223_v9  ;;  %v352_v23 = vmul.f32 %v348_v15, %v1217_v7  ;;  %v333_v33 = vrot.slane %v1215_v6, %v1237_v20  ;;  %v337_v34 = vrot.slane %v1217_v7, %v1237_v20  ;;  %p936_p8 = scmp.ne.s32.totalorder %s601_s7, %s935_s25  ;;  %s939_s18 = sshll.u32 %s1027_s1, 4  ;;  %s940_s18 = int_to_ptr.vmem [resolvable:$false] %s939_s18 }
  0x56   : > { %v374_v16 = vmul.f32 %v370_v11, %v1220_v8  ;;  %v351_v22 = vmul.f32 %v347_v14, %v1215_v6  ;;  %v339_v35 = vcombine.high %v329_v24, %v329_v24  ;;  %v463_v46 = vrot.slane %v1220_v8, 4  ;;  %s941_s26 = scalar_lea.vmem %s940_s18, 256  ;;  %p942_p1 = scmp.lt.s32.totalorder %s601_s7, %s940_s18 }
  0x57   : > { %v379_v27 = vrot.slane %v375_v17, 6  ;;  %v406_v29 = vmul.f32 %v402_v19, %v375_v17  ;;  %v362_v37 = vrot.slane %v352_v23, %v357_v21  ;;  %v464_v47 = vrot.slane %v1223_v9, 4  ;;  %v754_v17 = vld [vmem:[%s1242_s27 + $0x20] sm:$0xff]  ;;  %p937_p12 = pnand %p936_p8, %p1108_p9  ;;  %p943_p3 = scmp.lt.s32.totalorder %s941_s26, %s935_s25 }
  0x58   : > { %v378_v26 = vrot.slane %v374_v16, 6  ;;  %v405_v28 = vmul.f32 %v401_v18, %v374_v16  ;;  %v358_v36 = vrot.slane %v351_v22, %v357_v21  ;;  %v419_v48 = vsub.s32 3, %v1228_v13 }
  0x59   : > { %v383_v41 = vmul.f32 %v379_v27, %v1217_v7  ;;  %v410_v43 = vrot.slane %v406_v29, 5  ;;  %v437_v45 = vmul.f32 %v433_v31, %v406_v29  ;;  %v395_v49 = vcombine.high %v752_v39, %v752_v39  ;;  %p938_p0 = pneg %p937_p12  ;;  %p944_p2 = por %p943_p3, %p942_p1 }
  0x5a   : > { %v382_v40 = vmul.f32 %v378_v26, %v1215_v6  ;;  %v409_v42 = vrot.slane %v405_v28, 5  ;;  %v436_v44 = vmul.f32 %v432_v30, %v405_v28  ;;  %v341_v50 = vmul.f32 %v333_v33, %v329_v24 }
  0x5b   : > { %v342_v51 = vmul.f32 %v339_v35, %v337_v34  ;;  %v366_v52 = vmul.f32 %v751_v25, %v358_v36  ;;  %v367_v53 = vmul.f32 %v364_v38, %v362_v37  ;;  %v393_v55 = vrot.slane %v383_v41, %v388_v32  ;;  %v755_v37 = vld [vmem:[%s1242_s27 + $0x28] sm:$0xff]  ;;  %p945_p4 = pnand %p944_p2, %p938_p0 }
  0x5c   : > { %v389_v54 = vrot.slane %v382_v40, %v388_v32  ;;  %v413_v56 = vmul.f32 %v409_v42, %v1215_v6  ;;  %v414_v57 = vmul.f32 %v410_v43, %v1217_v7  ;;  %v440_v59 = vrot.slane %v436_v44, 4 }
  0x5d   : > { %v441_v60 = vrot.slane %v437_v45, 4  ;;  %v467_v61 = vmul.f32 %v463_v46, %v436_v44  ;;  %v468_v62 = vmul.f32 %v464_v47, %v437_v45  ;;  %v494_v63 = vrot.slane %v1220_v8, 5 }
  0x5e   : > { %v495_v1 = vrot.slane %v1223_v9, 5  ;;  %v450_v4 = vsub.s32 4, %v1228_v13  ;;  %v368_v5 = vadd.f32 %v366_v52, %v341_v50  ;;  %v369_v10 = vadd.f32 %v367_v53, %v342_v51 }
  0x5f   : > { %v426_v11 = vcombine.high %v753_v58, %v753_v58  ;;  %v397_v12 = vmul.f32 %v752_v39, %v389_v54  ;;  %v398_v14 = vmul.f32 %v395_v49, %v393_v55  ;;  %v420_v15 = vrot.slane %v413_v56, %v419_v48 }
  0x60   : > { %v424_v16 = vrot.slane %v414_v57, %v419_v48  ;;  %v444_v18 = vmul.f32 %v440_v59, %v1215_v6  ;;  %v445_v19 = vmul.f32 %v441_v60, %v1217_v7  ;;  %v471_v21 = vrot.slane %v467_v61, 3  ;;  %v756_v48 = vld [vmem:[%s1242_s27 + $0x30] sm:$0xff] }
  0x61   : > { %v472_v22 = vrot.slane %v468_v62, 3  ;;  %v498_v23 = vmul.f32 %v494_v63, %v467_v61  ;;  %v499_v24 = vmul.f32 %v495_v1, %v468_v62  ;;  %v525_v25 = vrot.slane %v1220_v8, 6  ;;  %v757_v63 = vld [vmem:[%s1242_s27 + $0x38] sm:$0xff] }
  0x62   : > { %v526_v26 = vrot.slane %v1223_v9, 6  ;;  %v481_v27 = vsub.s32 5, %v1228_v13  ;;  %v457_v28 = vcombine.high %v754_v17, %v754_v17  ;;  %v399_v29 = vadd.f32 %v397_v12, %v368_v5 }
  0x63   : > { %v400_v30 = vadd.f32 %v398_v14, %v369_v10  ;;  %v428_v31 = vmul.f32 %v753_v58, %v420_v15  ;;  %v429_v32 = vmul.f32 %v426_v11, %v424_v16  ;;  %v451_v33 = vrot.slane %v444_v18, %v450_v4 }
  0x64   : > { %v455_v34 = vrot.slane %v445_v19, %v450_v4  ;;  %v475_v35 = vmul.f32 %v471_v21, %v1215_v6  ;;  %v476_v36 = vmul.f32 %v472_v22, %v1217_v7  ;;  %v502_v38 = vrot.slane %v498_v23, 2 }
  0x65   : > { %v503_v39 = vrot.slane %v499_v24, 2  ;;  %v529_v8 = vmul.f32 %v525_v25, %v498_v23  ;;  %v530_v40 = vmul.f32 %v526_v26, %v499_v24  ;;  %v512_v9 = vsub.s32 6, %v1228_v13 }
  0x66   : > { %v430_v41 = vadd.f32 %v428_v31, %v399_v29  ;;  %v431_v42 = vadd.f32 %v429_v32, %v400_v30  ;;  %v488_v43 = vcombine.high %v755_v37, %v755_v37  ;;  %v459_v44 = vmul.f32 %v754_v17, %v451_v33 }
  0x67   : > { %v460_v45 = vmul.f32 %v457_v28, %v455_v34  ;;  %v482_v46 = vrot.slane %v475_v35, %v481_v27  ;;  %v486_v47 = vrot.slane %v476_v36, %v481_v27  ;;  %v506_v49 = vmul.f32 %v502_v38, %v1215_v6 }
  0x68   : > { %v507_v50 = vmul.f32 %v503_v39, %v1217_v7  ;;  %v533_v51 = vrot.slane %v529_v8, 1  ;;  %v534_v52 = vrot.slane %v530_v40, 1  ;;  %v543_v53 = vsub.s32 7, %v1228_v13 }
  0x69   : > { %v519_v54 = vcombine.high %v756_v48, %v756_v48  ;;  %v461_v55 = vadd.f32 %v459_v44, %v430_v41  ;;  %v462_v56 = vadd.f32 %v460_v45, %v431_v42  ;;  %v490_v57 = vmul.f32 %v755_v37, %v482_v46 }
  0x6a   : > { %v491_v58 = vmul.f32 %v488_v43, %v486_v47  ;;  %v513_v59 = vrot.slane %v506_v49, %v512_v9  ;;  %v517_v60 = vrot.slane %v507_v50, %v512_v9  ;;  %v537_v61 = vmul.f32 %v533_v51, %v1215_v6 }
  0x6b   : > { %v538_v62 = vmul.f32 %v534_v52, %v1217_v7  ;;  %v492_v1 = vadd.f32 %v490_v57, %v461_v55  ;;  %v550_v13 = vcombine.high %v757_v63, %v757_v63  ;;  %v559_v14 = vsel %vm556_vm2, 1, %v1026_v0 }
  0x6c   : > { %v493_v4 = vadd.f32 %v491_v58, %v462_v56  ;;  %v521_v5 = vmul.f32 %v756_v48, %v513_v59  ;;  %v522_v10 = vmul.f32 %v519_v54, %v517_v60  ;;  %v544_v11 = vrot.slane %v537_v61, %v543_v53 }
  0x6d   : > { %v548_v12 = vrot.slane %v538_v62, %v543_v53  ;;  %v560_v6 = vsel %vm557_vm3, 1, %v1026_v0  ;;  %v564_v2 = vrot.slane %v559_v14, %v1237_v20 }
  0x6e   : > { %v523_v15 = vadd.f32 %v521_v5, %v492_v1  ;;  %v524_v7 = vadd.f32 %v522_v10, %v493_v4  ;;  %v552_v16 = vmul.f32 %v757_v63, %v544_v11  ;;  %v568_v3 = vrot.slane %v560_v6, %v1237_v20 }
  0x6f   : > { %v553_v17 = vmul.f32 %v550_v13, %v548_v12  ;;  %vm569_vm4 = vcmp.eq.s32.totalorder %v564_v2, 1 }
  0x70   : > { %v554_v18 = vadd.f32 %v552_v16, %v523_v15  ;;  %vm570_vm5 = vcmp.eq.s32.totalorder %v568_v3, 1 }
  0x71   : > { %v555_v19 = vadd.f32 %v553_v17, %v524_v7 }
  0xcb   : > { %v574_v21 = vpop.permute.xlu0 %573 }
  0xcc   : > { %v576_v0 = vsel %vm569_vm4, %v574_v21, %v554_v18  ;;  %v577_v22 = vsel %vm570_vm5, %v574_v21, %v555_v19 }
  0xcd   : > { %v580_v23 = vcombine.low %v576_v0, %v577_v22 }
  0xcf   : > { %582 = vst [vmem:[%s314_s13] sm:$0xff] %v580_v23 }
  0xd0   : > { %948 = shalt.err (!%p945_p4)
}
  0xd1   : > { %s949_s10 = scalar_lea.hbm %s598_s6, 128  ;;  %s953_s8 = scalar_lea.hbm %s1333_s4, 256 }
  0xd2   : > { %p950_p5 = scmp.ne.s32.totalorder %s598_s6, %s949_s10  ;;  %p954_p10 = scmp.lt.s32.totalorder %s598_s6, %s1333_s4 }
  0xd3   : > { %p955_p13 = scmp.lt.s32.totalorder %s953_s8, %s949_s10 }
  0xd4   : > { %p951_p7 = pnand %p950_p5, %p1108_p9 }
  0xd5   : > { %p956_p8 = por %p955_p13, %p954_p10 }
  0xd6   : > { %p952_p6 = pneg %p951_p7 }
  0xd8   : > { %p957_p12 = pnand %p956_p8, %p952_p6 }
  0xda   : > { %960 = shalt.err (!%p957_p12)
}
  0xdb   : > { %773 = dma.vmem_to_hbm [thread:$0]  (%p1108_p9), %s601_s7, 128, %s598_s6, %s584_s17  }
  0xdc PF: > { %s1350_s23 = sld [smem:[#allocation13_spill]]  ;;  %s612_s14 = sand.u32 1, %s999_s15  }
  0xdd   : > { %s613_s21 = scalar_lea.sflag [#allocation4], %s612_s14 }
  0xe2   : > { %p1351_p0 = scmp.ge.s32.totalorder %s1350_s23, 2 }
  0xe4   : > { %p786_p1 = pnand %p1351_p0, %p1115_p11 }
  0xe6   : > { %p787_p3 = pneg %p786_p1 }
  0xe8   : > { %994 = dma.done.wait (%p787_p3), %s613_s21, 128  }
  0xe9   : > { %996 = vsyncadd (%p787_p3), %s613_s21, 4294967168  ;;  %s23_s20 = sadd.s32 1, %s1350_s23   ;;  %s1352_s27 = sld [smem:[#allocation12_spill]] }
  0xea   : > { %p20_p2 = scmp.ge.s32.totalorder %s23_s20, 4   ;;  %s1353_s17 = sld [smem:[#allocation15_spill]] }
  0xeb   : > { %s1354_s28 = sld [smem:[#allocation14_spill]]  ;;  %s1355_s15 = smov %s1003_s16 }
  0xec   : > { %s1357_s18 = smov %s1015_s19 }
  0xed   :  { %22 = sbr.rel (!%p20_p2) target bundleno = 10 (0xa), region = 112 }
  0xef   : > { %s1356_s16 = smov %s1352_s27 }
  0xf1   : > { %s1358_s19 = smov %s1354_s28 }
  0xf2   :  { %618 = vsyncpa [#allocation3], 1 }
  0xf3   :  { %620 = vsyncpa [#allocation3 + $0x1], 1 }
  0xf4   :  { %621 = vsyncpa [#allocation6], 1 }
  0xf5   :  { %623 = vsyncpa [#allocation6 + $0x1], 1 }
  0xf6   :  { %624 = vsyncpa [#allocation4], 1 }
  0xf7   :  { %626 = vsyncpa [#allocation4 + $0x1], 1 }

</bundles_post_ra>
